<compile_context>
chip_gen: v7x
topology: tpu7x:2x2x1
jax: 0.10.0
libtpu: 0.0.40
codegen_flags: <defaults>
</compile_context>

<pallas_src>
import functools
import math

import jax
import jax.numpy as jnp
from jax import lax
from jax.experimental import pallas as pl
from jax.experimental.pallas import tpu as pltpu

_VMEM_LIMIT = 48 * 1024 * 1024  # explicit scoped-VMEM limit, headroom under v7x's 64 MiB


# --------------------------------------------------------------------------- #
# Kernel 1: tiled linear projection  y = (x @ W_t + b) * scale
# --------------------------------------------------------------------------- #
def _linear_kernel(x_ref, w_ref, b_ref, o_ref, *, scale: float):
    acc = jnp.dot(x_ref[...], w_ref[...], preferred_element_type=jnp.float32)
    acc = acc + b_ref[...].astype(jnp.float32)
    if scale != 1.0:
        acc = acc * jnp.float32(scale)
    o_ref[...] = acc.astype(o_ref.dtype)


def _linear(x, w_t, b, *, tile: int, scale: float = 1.0, single_buffer_weights: bool):
    """x: (B, S, Din); w_t: (Din, Dout) = W^T (input-major); b: (1, Dout)."""
    B, S, Din = x.shape
    Dout = w_t.shape[1]
    ts = min(tile, S)
    assert S % ts == 0, "seq_len must be divisible by the projection tile size"

    wkw = {"pipeline_mode": pl.Buffered(1)} if single_buffer_weights else {}
    grid = (B, S // ts)
    x_spec = pl.BlockSpec((pl.Squeezed(), ts, Din), lambda bi, si: (bi, si, 0))
    w_spec = pl.BlockSpec((Din, Dout), lambda bi, si: (0, 0), **wkw)
    b_spec = pl.BlockSpec((1, Dout), lambda bi, si: (0, 0), **wkw)
    o_spec = pl.BlockSpec((pl.Squeezed(), ts, Dout), lambda bi, si: (bi, si, 0))

    itemsize = jnp.dtype(x.dtype).itemsize
    cost = pl.CostEstimate(
        flops=int(2 * B * S * Din * Dout),
        transcendentals=0,
        bytes_accessed=int(itemsize * (B * S * Din + B * S * Dout + Din * Dout + Dout)),
    )

    return pl.pallas_call(
        functools.partial(_linear_kernel, scale=scale),
        out_shape=jax.ShapeDtypeStruct((B, S, Dout), x.dtype),
        grid_spec=pltpu.PrefetchScalarGridSpec(
            num_scalar_prefetch=0, grid=grid,
            in_specs=[x_spec, w_spec, b_spec], out_specs=o_spec),
        compiler_params=pltpu.CompilerParams(
            dimension_semantics=("parallel", "parallel"),
            vmem_limit_bytes=_VMEM_LIMIT),
        cost_estimate=cost,
    )(x, w_t, b)


# --------------------------------------------------------------------------- #
# Kernel 2: flash attention over heads with fused W_o projection
# --------------------------------------------------------------------------- #
def _flash_wo_kernel(q_ref, k_ref, v_ref, wo_ref, bo_ref, o_ref,
                     m_sc, l_sc, acc_sc, oacc_sc):
    """One grid step = (batch b, q tile qi, head h, kv tile ki).

    q_ref : (tq, d_k)   k_ref/v_ref : (tk, d_k)   (head-major, pre-projected; Q pre-scaled)
    wo_ref: (d_k, D)    bo_ref : (1, D)           o_ref : (tq, D)
    scratch: m/l (tq,1) f32, acc (tq,d_k) f32, oacc (tq,D) f32 (fused W_o accumulator).
    """
    h = pl.program_id(2)
    ki = pl.program_id(3)
    nh = pl.num_programs(2)
    nk = pl.num_programs(3)
    cdt = q_ref.dtype  # MXU operand dtype (bf16 stays bf16, f32 stays f32)

    # Once per (b, q-tile): start the fused W_o accumulation from the output bias.
    @pl.when(jnp.logical_and(h == 0, ki == 0))
    def _init_output():
        oacc_sc[...] = jnp.zeros_like(oacc_sc) + bo_ref[...].astype(jnp.float32)

    # Once per (b, q-tile, head): reset the online-softmax state.
    @pl.when(ki == 0)
    def _init_head():
        m_sc[...] = jnp.full_like(m_sc, -jnp.inf)
        l_sc[...] = jnp.zeros_like(l_sc)
        acc_sc[...] = jnp.zeros_like(acc_sc)

    # scores = Q_h @ K_h^T  (Q already carries the 1/sqrt(d_k) scale; no transpose op).
    s = lax.dot_general(q_ref[...], k_ref[...], (((1,), (1,)), ((), ())),
                        preferred_element_type=jnp.float32)            # (tq, tk)
    m_prev = m_sc[...]
    m_new = jnp.maximum(m_prev, jnp.max(s, axis=-1, keepdims=True))
    alpha = jnp.exp(m_prev - m_new)
    p = jnp.exp(s - m_new)
    l_sc[...] = alpha * l_sc[...] + jnp.sum(p, axis=-1, keepdims=True)
    acc_sc[...] = alpha * acc_sc[...] + jnp.dot(
        p.astype(cdt), v_ref[...], preferred_element_type=jnp.float32)
    m_sc[...] = m_new

    # Last KV tile of this head: normalize once, fold this head's W_o slab into the
    # lane-dense f32 output accumulator (explicit scratch, no long traced add chain).
    @pl.when(ki == nk - 1)
    def _fold_head():
        inv_l = pl.reciprocal(l_sc[...], approx=True)   # EUP slot, nearly free
        inv_l = inv_l * (2.0 - l_sc[...] * inv_l)       # one Newton step -> f32 accuracy
        o_h = (acc_sc[...] * inv_l).astype(cdt)         # (tq, d_k)
        oacc_sc[...] += jnp.dot(o_h, wo_ref[...], preferred_element_type=jnp.float32)

    # Last head + last KV tile: single lane-dense (tq, D) store.
    @pl.when(jnp.logical_and(h == nh - 1, ki == nk - 1))
    def _store():
        o_ref[...] = oacc_sc[...].astype(o_ref.dtype)


# --------------------------------------------------------------------------- #
# Wrapper
# --------------------------------------------------------------------------- #
def _mha_forward(q, k, v, params, *, num_heads, q_tile, kv_tile, proj_tile,
                 single_buffer_weights):
    B, S, D = q.shape
    assert D % num_heads == 0, "d_model must be divisible by num_heads"
    d_k = D // num_heads
    dtype = q.dtype
    scale = 1.0 / math.sqrt(d_k)

    def w_t(name):   # PyTorch Linear weight is (out, in) -> transpose to input-major
        return params[name].T.astype(dtype)

    def b2(name):
        return params[name].reshape(1, D).astype(dtype)

    # ---- Q/K/V projections, each computed exactly once (review item #1).
    qp = _linear(q, w_t("wq"), b2("bq"), tile=proj_tile, scale=scale,
                 single_buffer_weights=single_buffer_weights)
    kp = _linear(k, w_t("wk"), b2("bk"), tile=proj_tile,
                 single_buffer_weights=single_buffer_weights)
    vp = _linear(v, w_t("wv"), b2("bv"), tile=proj_tile,
                 single_buffer_weights=single_buffer_weights)

    # ---- Head-major layout (B, H, S, d_k): layout plumbing only, keeps d_k un-padded.
    def to_heads(x):
        return x.reshape(B, S, num_heads, d_k).transpose(0, 2, 1, 3)

    qh, kh, vh = to_heads(qp), to_heads(kp), to_heads(vp)

    # ---- W_o as head-major input slabs (H, d_k, D); bias (1, D).
    wo = params["wo"].T.reshape(num_heads, d_k, D).astype(dtype)
    bo = params["bo"].reshape(1, D).astype(dtype)

    tq = min(q_tile, S)
    tk = min(kv_tile, S)
    assert S % tq == 0 and S % tk == 0, "seq_len must be divisible by the tile sizes"

    grid = (B, S // tq, num_heads, S // tk)

    bkw = {"pipeline_mode": pl.Buffered(1)} if single_buffer_weights else {}
    q_spec = pl.BlockSpec((pl.Squeezed(), pl.Squeezed(), tq, d_k),
                          lambda b, qi, h, ki: (b, h, qi, 0))
    kv_spec = pl.BlockSpec((pl.Squeezed(), pl.Squeezed(), tk, d_k),
                           lambda b, qi, h, ki: (b, h, ki, 0))
    # wo streams per head -> keep default double-buffering so the next head prefetches.
    wo_spec = pl.BlockSpec((pl.Squeezed(), d_k, D), lambda b, qi, h, ki: (h, 0, 0))
    bo_spec = pl.BlockSpec((1, D), lambda b, qi, h, ki: (0, 0), **bkw)
    out_spec = pl.BlockSpec((pl.Squeezed(), tq, D), lambda b, qi, h, ki: (b, qi, 0))

    itemsize = jnp.dtype(dtype).itemsize
    n_q = S // tq
    cost = pl.CostEstimate(
        flops=int(4 * B * S * S * D + 2 * B * S * D * D),
        transcendentals=int(B * num_heads * S * S),
        bytes_accessed=int(itemsize * (B * S * D                  # Q
                                       + 2 * B * S * D * n_q      # K, V re-fetched per q tile
                                       + B * S * D                # output
                                       + B * n_q * D * D + D)),   # W_o slabs per (b, q tile)
    )

    return pl.pallas_call(
        _flash_wo_kernel,
        out_shape=jax.ShapeDtypeStruct((B, S, D), dtype),
        grid_spec=pltpu.PrefetchScalarGridSpec(
            num_scalar_prefetch=0, grid=grid,
            in_specs=[q_spec, kv_spec, kv_spec, wo_spec, bo_spec],
            out_specs=out_spec,
            scratch_shapes=[
                pltpu.VMEM((tq, 1), jnp.float32),    # running max
                pltpu.VMEM((tq, 1), jnp.float32),    # running sum
                pltpu.VMEM((tq, d_k), jnp.float32),  # per-head output accumulator
                pltpu.VMEM((tq, D), jnp.float32),    # fused W_o output accumulator
            ]),
        compiler_params=pltpu.CompilerParams(
            dimension_semantics=("parallel", "parallel", "arbitrary", "arbitrary"),
            vmem_limit_bytes=_VMEM_LIMIT),
        cost_estimate=cost,
    )(qh, kh, vh, wo, bo)


def multi_head_attention(q, k, v, params, *, num_heads,
                         q_tile=256, kv_tile=256, proj_tile=256):
    """q, k, v: (B, S, D). params: PyTorch-layout weights (out, in) + biases (D,)."""
    # TODO(synk): optional attention-mask path (mask=None in this synthetic run) is not
    # implemented in-kernel.
    kwargs = dict(num_heads=num_heads, q_tile=q_tile, kv_tile=kv_tile, proj_tile=proj_tile)
    try:
        # Single-buffer the constant-index weight/bias blocks (halves their VMEM
        # residency; matters on v7x's 64 MiB VMEM and v5e's 16 MiB scoped default).
        return _mha_forward(q, k, v, params, single_buffer_weights=True, **kwargs)
    except Exception:
        # Fallback for Pallas/Mosaic builds that reject pipeline_mode=pl.Buffered(1)
        # on the pallas_call pipeline; default double-buffering is still correct.
        return _mha_forward(q, k, v, params, single_buffer_weights=False, **kwargs)


def reference_mha(q, k, v, params, *, num_heads):
    """Pure-JAX reference mirroring the PyTorch module (mask=None)."""
    B, S, D = q.shape
    d_k = D // num_heads

    def lin(x, w, b):
        return x @ w.T + b

    Q = lin(q, params["wq"], params["bq"]).reshape(B, S, num_heads, d_k).transpose(0, 2, 1, 3)
    K = lin(k, params["wk"], params["bk"]).reshape(B, S, num_heads, d_k).transpose(0, 2, 1, 3)
    V = lin(v, params["wv"], params["bv"]).reshape(B, S, num_heads, d_k).transpose(0, 2, 1, 3)
    scores = jnp.einsum("bhqd,bhkd->bhqk", Q, K) / jnp.sqrt(jnp.float32(d_k))
    attn = jax.nn.softmax(scores, axis=-1)
    out = jnp.einsum("bhqk,bhkd->bhqd", attn, V)
    out = out.transpose(0, 2, 1, 3).reshape(B, S, D)
    return lin(out, params["wo"], params["bo"])


if __name__ == "__main__":
    B, S, D, H = 2, 8, 32, 4   # batch, seq, d_model, num_heads -> d_k = 8

    key = jax.random.PRNGKey(0)
    keys = jax.random.split(key, 11)
    q = jax.random.normal(keys[0], (B, S, D), jnp.float32)
    k = jax.random.normal(keys[1], (B, S, D), jnp.float32)
    v = jax.random.normal(keys[2], (B, S, D), jnp.float32)

    # Deterministic parameters (PyTorch nn.Linear layout: weight (out, in), bias (out,))
    bound = 1.0 / jnp.sqrt(jnp.float32(D))
    params = {
        "wq": jax.random.uniform(keys[3], (D, D), jnp.float32, -bound, bound),
        "bq": jax.random.uniform(keys[4], (D,), jnp.float32, -bound, bound),
        "wk": jax.random.uniform(keys[5], (D, D), jnp.float32, -bound, bound),
        "bk": jax.random.uniform(keys[6], (D,), jnp.float32, -bound, bound),
        "wv": jax.random.uniform(keys[7], (D, D), jnp.float32, -bound, bound),
        "bv": jax.random.uniform(keys[8], (D,), jnp.float32, -bound, bound),
        "wo": jax.random.uniform(keys[9], (D, D), jnp.float32, -bound, bound),
        "bo": jax.random.uniform(keys[10], (D,), jnp.float32, -bound, bound),
    }

    out = multi_head_attention(q, k, v, params, num_heads=H)
    out = jax.block_until_ready(out)

    ref = reference_mha(q, k, v, params, num_heads=H)
    assert out.shape == (B, S, D)
    max_err = float(jnp.max(jnp.abs(out - ref)))
    # Tolerance covers the EUP approximate-reciprocal (+Newton) softmax normalization.
    assert jnp.allclose(out, ref, atol=2e-3, rtol=2e-3), \
        f"kernel output mismatch vs reference (max abs err {max_err})"

    print("KERNEL_OK")
</pallas_src>

<mosaic_0001>
module attributes {stable_mosaic.version = 11 : i64} {
  func.func @_linear_kernel(%arg0: i32, %arg1: i32, %arg2: memref<1x8x32xf32, #tpu.memory_space<vmem>>, %arg3: memref<32x32xf32, #tpu.memory_space<vmem>>, %arg4: memref<1x32xf32, #tpu.memory_space<vmem>>, %arg5: memref<1x8x32xf32, #tpu.memory_space<vmem>>) attributes {dimension_semantics = [#tpu.dimension_semantics<parallel>, #tpu.dimension_semantics<parallel>], iteration_bounds = array<i64: 2, 1>, scalar_prefetch = 0 : i64, scratch_operands = 0 : i64, tpu.core_type = #tpu.core_type<tc>, window_params = [{transform_indices = @transform_0, window_bounds = array<i64: 1, 8, 32>}, {pipeline_mode = #tpu.pipeline_mode<synchronous>, transform_indices = @transform_1, window_bounds = array<i64: 32, 32>}, {pipeline_mode = #tpu.pipeline_mode<synchronous>, transform_indices = @transform_2, window_bounds = array<i64: 1, 32>}, {transform_indices = @transform_3, window_bounds = array<i64: 1, 8, 32>}]} {
    %c0 = arith.constant 0 : index
    %c0_0 = arith.constant 0 : index
    %c0_1 = arith.constant 0 : index
    %0 = vector.load %arg2[%c0, %c0_0, %c0_1] : memref<1x8x32xf32, #tpu.memory_space<vmem>>, vector<1x8x32xf32>
    %1 = vector.shape_cast %0 : vector<1x8x32xf32> to vector<8x32xf32>
    %c0_2 = arith.constant 0 : index
    %c0_3 = arith.constant 0 : index
    %2 = vector.load %arg3[%c0_2, %c0_3] : memref<32x32xf32, #tpu.memory_space<vmem>>, vector<32x32xf32>
    %cst = arith.constant dense<0.000000e+00> : vector<8x32xf32>
    %3 = tpu.matmul %1, %2, %cst {dimension_numbers = #tpu.dot_dimension_numbers<[1], [0], [0], [1], [0, 0, 1, 1], [], []>} : vector<8x32xf32>, vector<32x32xf32>, vector<8x32xf32> -> vector<8x32xf32>
    %c0_4 = arith.constant 0 : index
    %c0_5 = arith.constant 0 : index
    %4 = vector.load %arg4[%c0_4, %c0_5] : memref<1x32xf32, #tpu.memory_space<vmem>>, vector<1x32xf32>
    %5 = vector.broadcast %4 : vector<1x32xf32> to vector<8x32xf32>
    %6 = arith.addf %3, %5 : vector<8x32xf32>
    %cst_6 = arith.constant 0.353553385 : f32
    %7 = vector.broadcast %cst_6 : f32 to vector<8x32xf32>
    %8 = arith.mulf %6, %7 : vector<8x32xf32>
    %c0_7 = arith.constant 0 : index
    %c0_8 = arith.constant 0 : index
    %c0_9 = arith.constant 0 : index
    %9 = vector.load %arg5[%c0_7, %c0_8, %c0_9] : memref<1x8x32xf32, #tpu.memory_space<vmem>>, vector<1x8x32xf32>
    %10 = vector.shape_cast %9 : vector<1x8x32xf32> to vector<8x32xf32>
    %11 = vector.shape_cast %8 : vector<8x32xf32> to vector<1x8x32xf32>
    tpu.vector_store %arg5[%c0_7, %c0_8, %c0_9], %11 {strides = array<i32>} : memref<1x8x32xf32, #tpu.memory_space<vmem>>, vector<1x8x32xf32>,
    return
  }
  func.func @transform_0(%arg0: i32, %arg1: i32) -> (i32, i32, i32) {
    %c0_i32 = arith.constant 0 : i32
    %c0_i32_0 = arith.constant 0 : i32
    return %arg0, %arg1, %c0_i32 : i32, i32, i32
  }
  func.func @transform_1(%arg0: i32, %arg1: i32) -> (i32, i32) {
    %c0_i32 = arith.constant 0 : i32
    %c0_i32_0 = arith.constant 0 : i32
    %c0_i32_1 = arith.constant 0 : i32
    return %c0_i32, %c0_i32_0 : i32, i32
  }
  func.func @transform_2(%arg0: i32, %arg1: i32) -> (i32, i32) {
    %c0_i32 = arith.constant 0 : i32
    %c0_i32_0 = arith.constant 0 : i32
    %c0_i32_1 = arith.constant 0 : i32
    return %c0_i32, %c0_i32_0 : i32, i32
  }
  func.func @transform_3(%arg0: i32, %arg1: i32) -> (i32, i32, i32) {
    %c0_i32 = arith.constant 0 : i32
    %c0_i32_0 = arith.constant 0 : i32
    return %arg0, %arg1, %c0_i32 : i32, i32, i32
  }
}

module attributes {stable_mosaic.version = 11 : i64} {
  func.func @_linear_kernel(%arg0: i32, %arg1: i32, %arg2: memref<1x8x32xf32, #tpu.memory_space<vmem>>, %arg3: memref<32x32xf32, #tpu.memory_space<vmem>>, %arg4: memref<1x32xf32, #tpu.memory_space<vmem>>, %arg5: memref<1x8x32xf32, #tpu.memory_space<vmem>>) attributes {dimension_semantics = [#tpu.dimension_semantics<parallel>, #tpu.dimension_semantics<parallel>], iteration_bounds = array<i64: 2, 1>, scalar_prefetch = 0 : i64, scratch_operands = 0 : i64, tpu.core_type = #tpu.core_type<tc>, window_params = [{transform_indices = @transform_0, window_bounds = array<i64: 1, 8, 32>}, {pipeline_mode = #tpu.pipeline_mode<synchronous>, transform_indices = @transform_1, window_bounds = array<i64: 32, 32>}, {pipeline_mode = #tpu.pipeline_mode<synchronous>, transform_indices = @transform_2, window_bounds = array<i64: 1, 32>}, {transform_indices = @transform_3, window_bounds = array<i64: 1, 8, 32>}]} {
    %c0 = arith.constant 0 : index
    %c0_0 = arith.constant 0 : index
    %c0_1 = arith.constant 0 : index
    %0 = vector.load %arg2[%c0, %c0_0, %c0_1] : memref<1x8x32xf32, #tpu.memory_space<vmem>>, vector<1x8x32xf32>
    %1 = vector.shape_cast %0 : vector<1x8x32xf32> to vector<8x32xf32>
    %c0_2 = arith.constant 0 : index
    %c0_3 = arith.constant 0 : index
    %2 = vector.load %arg3[%c0_2, %c0_3] : memref<32x32xf32, #tpu.memory_space<vmem>>, vector<32x32xf32>
    %cst = arith.constant dense<0.000000e+00> : vector<8x32xf32>
    %3 = tpu.matmul %1, %2, %cst {dimension_numbers = #tpu.dot_dimension_numbers<[1], [0], [0], [1], [0, 0, 1, 1], [], []>} : vector<8x32xf32>, vector<32x32xf32>, vector<8x32xf32> -> vector<8x32xf32>
    %c0_4 = arith.constant 0 : index
    %c0_5 = arith.constant 0 : index
    %4 = vector.load %arg4[%c0_4, %c0_5] : memref<1x32xf32, #tpu.memory_space<vmem>>, vector<1x32xf32>
    %5 = vector.broadcast %4 : vector<1x32xf32> to vector<8x32xf32>
    %6 = arith.addf %3, %5 : vector<8x32xf32>
    %cst_6 = arith.constant 0.353553385 : f32
    %7 = vector.broadcast %cst_6 : f32 to vector<8x32xf32>
    %8 = arith.mulf %6, %7 : vector<8x32xf32>
    %c0_7 = arith.constant 0 : index
    %c0_8 = arith.constant 0 : index
    %c0_9 = arith.constant 0 : index
    %9 = vector.load %arg5[%c0_7, %c0_8, %c0_9] : memref<1x8x32xf32, #tpu.memory_space<vmem>>, vector<1x8x32xf32>
    %10 = vector.shape_cast %9 : vector<1x8x32xf32> to vector<8x32xf32>
    %11 = vector.shape_cast %8 : vector<8x32xf32> to vector<1x8x32xf32>
    tpu.vector_store %arg5[%c0_7, %c0_8, %c0_9], %11 {strides = array<i32>} : memref<1x8x32xf32, #tpu.memory_space<vmem>>, vector<1x8x32xf32>,
    return
  }
  func.func @transform_0(%arg0: i32, %arg1: i32) -> (i32, i32, i32) {
    %c0_i32 = arith.constant 0 : i32
    %c0_i32_0 = arith.constant 0 : i32
    return %arg0, %arg1, %c0_i32 : i32, i32, i32
  }
  func.func @transform_1(%arg0: i32, %arg1: i32) -> (i32, i32) {
    %c0_i32 = arith.constant 0 : i32
    %c0_i32_0 = arith.constant 0 : i32
    %c0_i32_1 = arith.constant 0 : i32
    return %c0_i32, %c0_i32_0 : i32, i32
  }
  func.func @transform_2(%arg0: i32, %arg1: i32) -> (i32, i32) {
    %c0_i32 = arith.constant 0 : i32
    %c0_i32_0 = arith.constant 0 : i32
    %c0_i32_1 = arith.constant 0 : i32
    return %c0_i32, %c0_i32_0 : i32, i32
  }
  func.func @transform_3(%arg0: i32, %arg1: i32) -> (i32, i32, i32) {
    %c0_i32 = arith.constant 0 : i32
    %c0_i32_0 = arith.constant 0 : i32
    return %arg0, %arg1, %c0_i32 : i32, i32, i32
  }
}

</mosaic_0001>

<bundles_post_ra>
// kernel: tpu_custom_call.1
= control target key start
LH: loop header
LB: loop body
LE: loop exit
PB: predicated region body
PF: predicated region fallthrough
CT: control target
= control target key end

     0   :  { %8 = vsyncpa [#allocation3], 0  ;;  %s919_s0 = inlined_call_operand.hbm [shape: f32[2,8,32], index: 0, kind: input, shape index: {}]   ;;  %s920_s1 = inlined_call_operand.hbm [shape: f32[32,32], index: 1, kind: input, shape index: {}]   ;;  %s921_s2 = inlined_call_operand.vmem [shape: f32[1,32], index: 2, kind: input, shape index: {}]   ;;  %s922_s3 = inlined_call_operand.hbm [shape: f32[2,8,32], index: 3, kind: output, shape index: {}]  }
   0x1   :  { %10 = vsyncpa [#allocation3 + $0x1], 0 }
   0x2   :  { %11 = vsyncpa [#allocation6], 0 }
   0x3   :  { %12 = vsyncpa [#allocation4], 0 }
   0x4   :  { %14 = vsyncpa [#allocation4 + $0x1], 0  ;;  %s702_s12 = smov 0   ;;  %s704_s13 = smov 0  }
   0x5   :  { %s706_s14 = smov 0   ;;  %s708_s15 = smov 0  }
   0x6   :  { %s710_s16 = smov 0   ;;  %s712_s17 = smov 0  }
   0x7 LB: > { %s411_s18 = sadd.s32 4294967295, %s672_s17   ;;  %s412_s19 = sadd.s32 4294967294, %s672_s17   ;;  %s672_s17 = sphi %s712_s17, %s20_s17   ;;  %s668_s16 = sphi %s710_s16, %s946_s16   ;;  %s664_s15 = sphi %s708_s15, %s945_s15   ;;  %s660_s14 = sphi %s706_s14, %s944_s14   ;;  %s656_s13 = sphi %s704_s13, %s943_s13   ;;  %s652_s12 = sphi %s702_s12, %s942_s12  }
   0x8   : > { %p54_p0 = scmp.ne.s32.totalorder %s656_s13, %s652_s12  ;;  %p736_p1 = scmp.eq.s32.totalorder %s411_s18, 0 }
   0x9   : > { %p740_p2 = scmp.eq.s32.totalorder %s411_s18, 1  ;;  %p128_p3 = scmp.eq.s32.totalorder %s412_s19, 1 }
   0xa   : > { %s927_s20 = scalar_select %p736_p1, 1, 0 }
   0xb   : > { %s928_s21 = scalar_select %p740_p2, 1, 0 }
   0xc   : > { %p746_p4 = por %p736_p1, %p54_p0  ;;  %p413_p5 = scmp.ge.s32.totalorder %s672_s17, 1 }
   0xd   : > { %p751_p6 = por %p128_p3, %p54_p0  ;;  %p135_p7 = scmp.lt.s32.totalorder %s672_s17, 3 }
   0xe   : > { %s929_s22 = scalar_select %p746_p4, 1, 0 }
   0xf   : > { %s930_s23 = scalar_select %p751_p6, 1, 0 }
  0x10   : > { %p756_p8 = pnand %p413_p5, %p135_p7  ;;  %s674_s25 = smov [#allocation5]  }
  0x11   : > { %s147_s26 = sshll.u32 %s674_s25, 4  ;;  %s32_s28 = sadd.s32 1, %s668_s16  ;;  %s148_s26 = int_to_ptr.vmem [resolvable:$true] %s147_s26 }
  0x12   : > { %s931_s24 = scalar_select %p756_p8, 1, 0 }
  0x13   : > { %p458_p9 = pneg %p756_p8  ;;  %s528_s4 = scalar_lea.hbm %s920_s1, 512 }
  0x14   : > { %p529_p12 = scmp.ne.s32.totalorder %s920_s1, %s528_s4  ;;  %p535_p5 = scmp.lt.u32.totalorder %s528_s4, %s920_s1 }
  0x15   : > { %p765_p11 = pnand %p458_p9, %p736_p1 }
  0x17   : > { %p530_p13 = pneg %p765_p11 }
  0x19   : > { %p531_p0 = pnand %p530_p13, %p529_p12 }
  0x1b   : > { %p532_p3 = pneg %p531_p0 }
  0x1d   : > { %p537_p7 = pnand %p535_p5, %p532_p3 }
  0x1f   : > { %540 = shalt.err (!%p537_p7)
}
  0x20   : > { %s541_s9 = scalar_lea.vmem %s148_s26, 512  ;;  %p549_p1 = scmp.lt.s32.totalorder %s148_s26, %s148_s26 }
  0x21   : > { %p542_p9 = scmp.ne.s32.totalorder %s148_s26, %s541_s9  ;;  %p550_p4 = scmp.lt.s32.totalorder %s541_s9, %s541_s9 }
  0x23   : > { %p544_p10 = pnand %p542_p9, %p530_p13  ;;  %p551_p8 = por %p550_p4, %p549_p1 }
  0x25   : > { %p545_p6 = pneg %p544_p10 }
  0x27   : > { %p552_p2 = pnand %p551_p8, %p545_p6 }
  0x29   : > { %555 = shalt.err (!%p552_p2)
}
  0x2a   : > { %s675_s10 = smov 128   ;;  %s676_s11 = smov 8  }
  0x2b   : > { %461 = dma.hbm_to_vmem [thread:$0]  (!%p765_p11), %s920_s1, 512, %s148_s26, [#allocation6], %s675_s10, %s675_s10, %s676_s11  }
  0x2c   : > { %p34_p1 = scmp.ge.s32.totalorder %s32_s28, 2  ;;  %s41_s25 = sadd.s32 1, %s660_s14 }
  0x2d   : > { %p48_p2 = scmp.ne.s32.totalorder %s660_s14, %s656_s13  ;;  %p49_p4 = scmp.eq.s32.totalorder %s672_s17, 0 }
  0x2e   : > { %s948_s28 = smov (%p34_p1, %s32_s28), 0  ;;  %p934_p8 = scmp.ne.s32.totalorder %s928_s21, 0 }
  0x2f   : > { %p792_p6 = por %p49_p4, %p48_p2  ;;  %s36_s27 = ssub.s32 %s668_s16, %s948_s28 }
  0x30   : > { %p798_p10 = por %p934_p8, %p48_p2  ;;  %p471_p12 = scmp.lt.s32.totalorder %s672_s17, 2 }
  0x31   : > { %p39_p11 = scmp.eq.s32.totalorder %s36_s27, 0  ;;  %s164_s26 = sand.u32 1, %s660_s14  }
  0x32   : > { %s416_s4 = sshll.u32 %s164_s26, 3  ;;  %s417_s6 = sshll.u32 %s668_s16, 7 }
  0x33   : > { %s807_s5 = scalar_select %p39_p11, %s660_s14, %s41_s25  }
  0x34   : > { %s813_s9 = scalar_lea.hbm %s919_s0, %s417_s6  ;;  %s168_s21 = scalar_lea.vmem [#allocation2], %s416_s4 }
  0x35   : > { %s176_s10 = sshll.u32 %s168_s21, 4  ;;  %p819_p13 = pnand %p471_p12, %p792_p6  ;;  %s815_s10 = int_to_ptr.vmem [resolvable:$true] %s176_s10 }
  0x36   : > { %s165_s18 = scalar_lea.sflag [#allocation3], %s164_s26  ;;  %s556_s19 = scalar_lea.hbm %s813_s9, 128 }
  0x37   : > { %p557_p0 = scmp.ne.s32.totalorder %s813_s9, %s556_s19  ;;  %p558_p3 = pneg %p819_p13 }
  0x38   : > { %s561_s4 = scalar_lea.hbm %s919_s0, 256  ;;  %p562_p9 = scmp.lt.u32.totalorder %s813_s9, %s919_s0 }
  0x39   : > { %p559_p5 = pnand %p558_p3, %p557_p0  ;;  %p563_p1 = scmp.lt.u32.totalorder %s561_s4, %s556_s19 }
  0x3a   : > { %p565_p4 = scmp.lt.u32.totalorder %s556_s19, %s813_s9 }
  0x3b   : > { %p560_p7 = pneg %p559_p5  ;;  %p564_p2 = por %p563_p1, %p562_p9 }
  0x3d   : > { %p566_p6 = por %p565_p4, %p564_p2 }
  0x3f   : > { %p567_p8 = pnand %p566_p6, %p560_p7 }
  0x41   : > { %570 = shalt.err (!%p567_p8)
}
  0x42   : > { %s571_s26 = scalar_lea.vmem %s815_s10, 128  ;;  %s677_s7 = smov [#allocation2]  }
  0x43   : > { %p572_p12 = scmp.ne.s32.totalorder %s815_s10, %s571_s26  ;;  %s576_s8 = sshll.u32 %s677_s7, 4  ;;  %s577_s8 = int_to_ptr.vmem [resolvable:$false] %s576_s8 }
  0x44   : > { %s578_s21 = scalar_lea.vmem %s577_s8, 256  ;;  %p579_p5 = scmp.lt.s32.totalorder %s815_s10, %s577_s8 }
  0x45   : > { %p574_p11 = pnand %p572_p12, %p558_p3  ;;  %p580_p9 = scmp.lt.s32.totalorder %s578_s21, %s571_s26 }
  0x47   : > { %p575_p0 = pneg %p574_p11  ;;  %p581_p1 = por %p580_p9, %p579_p5 }
  0x49   : > { %p582_p2 = pnand %p581_p1, %p575_p0 }
  0x4b   : > { %585 = shalt.err (!%p582_p2)
}
  0x4c   : > { %465 = dma.hbm_to_vmem [thread:$0]  (!%p819_p13), %s813_s9, 128, %s815_s10, %s165_s18  }
  0x4d   : > { %p937_p7 = scmp.ne.s32.totalorder %s931_s24, 0 }
  0x4e   : > { %s851_s19 = sand.u32 (!%p937_p7), 1, %s656_s13   ;;  %p938_p3 = scmp.ne.s32.totalorder (!%p937_p7), %s929_s22, 0 }
  0x4f   : > { %185 = sbr.rel (%p937_p7) target bundleno = 331 (0x14b), region = 32  ;;  %s419_s25 = sshll.u32 (!%p937_p7), %s851_s19, 3 }
  0x50   : > { %s188_s27 = scalar_lea.sflag (!%p937_p7), [#allocation3], %s851_s19  ;;  %s191_s4 = scalar_lea.vmem (!%p937_p7), [#allocation2], %s419_s25 }
  0x56   : > { %639 = dma.done.wait (%p938_p3), %s188_s27, 128  }
  0x57   : > { %641 = vsyncadd (%p938_p3), %s188_s27, 4294967168  ;;  %p939_p4 = scmp.ne.s32.totalorder %s927_s20, 0 }
  0x59   : > { %643 = dma.done.wait (%p939_p4), [#allocation6], 512  }
  0x5a   : > { %645 = vsyncadd (%p939_p4), [#allocation6], 4294966784  ;;  %v678_v0 = vmov 0.0|0.0   ;;  %vm679_vm0 = vmmov 0   ;;  %v680_v1 = vmov 0.0   ;;  %v219_v2 = vld [vmem:[#allocation5] sm:$0xff] }
  0x5b   : > { %444 = vmatprep.subr.bf16.mxu0 %v678_v0  ;;  %441 = vmatprep.mubr.msk.f32.mxu0 %vm679_vm0, %v680_v1  ;;  %v220_v3 = vld [vmem:[#allocation5 + $0x8] sm:$0xff]  ;;  %v221_v4 = vld [vmem:[#allocation5 + $0x10] sm:$0xff]  ;;  %v222_v6 = vld [vmem:[#allocation5 + $0x18] sm:$0xff]  ;;  %vm230_vm1 = vcmask 261120   ;;  %s425_s24 = sshll.u32 %s664_s15, 7  ;;  %s217_s9 = scalar_lea.vmem [#allocation7], %s419_s25 }
  0x5c   : > { %v445_v5 = vpack.c.bf16 %v220_v3, %v219_v2  ;;  %v448_v7 = vpack.c.bf16 %v222_v6, %v221_v4  ;;  %v218_v8 = vld [vmem:[%s191_s4] sm:$0xff]  ;;  %s321_s10 = sshll.u32 %s217_s9, 4  ;;  %s870_s29 = scalar_lea.hbm %s922_s3, %s425_s24  ;;  %s872_s10 = int_to_ptr.vmem [resolvable:$true] %s321_s10 }
  0x5d   : > { %v422_v9 = vld [vmem:[%s921_s2] ss:$0 sm:$0xff]  ;;  %s307_s6 = scalar_lea.sflag [#allocation4], %s851_s19  ;;  %s586_s26 = scalar_lea.vmem %s872_s10, 128 }
  0x5e   : > { %446 = vmatpush3.bf16.msra.mxu0 %v445_v5  ;;  %p587_p13 = scmp.ne.s32.totalorder %s872_s10, %s586_s26  ;;  %s681_s15 = smov [#allocation7]  }
  0x5f   : > { %447 = vmatprep.subr.bf16.mxu0 %v678_v0  ;;  %s590_s7 = sshll.u32 %s681_s15, 4  ;;  %s591_s7 = int_to_ptr.vmem [resolvable:$false] %s590_s7 }
  0x60   : > { %p588_p6 = pnand %p587_p13, %p798_p10  ;;  %s592_s8 = scalar_lea.vmem %s591_s7, 256 }
  0x61   : > { %p593_p12 = scmp.lt.s32.totalorder %s872_s10, %s591_s7  ;;  %p594_p11 = scmp.lt.s32.totalorder %s592_s8, %s586_s26 }
  0x62   : > { %449 = vmatpush3.bf16.msra.mxu0 %v448_v7  ;;  %p589_p8 = pneg %p588_p6 }
  0x63   : > { %p595_p0 = por %p594_p11, %p593_p12 }
  0x65   : > { %442 = vmatmul.mubr.msk.f32.vlgmr.msra.gmra.mrb[0].mxu0 %vm230_vm1, %v218_v8  ;;  %p596_p5 = pnand %p595_p0, %p589_p8 }
 0x138   : > { %v300_v10 = vpop.f32.mrb[0].mxu0 }
 0x139   : > { %v301_v11 = vadd.f32 %v422_v9, %v300_v10  ;;  %v443_v12 = vpop.f32.mrb[1].mxu0 }
 0x13b   : > { %v304_v13 = vmul.f32 0.35355338, %v301_v11 }
 0x13d   : > { %305 = vst.msk [vmem:[%s217_s9] sm:$0xff] %vm230_vm1, %v304_v13 }
 0x13e   : > { %599 = shalt.err (!%p596_p5)
}
 0x13f   : > { %s600_s21 = scalar_lea.hbm %s870_s29, 128  ;;  %s604_s27 = scalar_lea.hbm %s922_s3, 256 }
 0x140   : > { %p601_p9 = scmp.ne.s32.totalorder %s870_s29, %s600_s21  ;;  %p605_p7 = scmp.lt.u32.totalorder %s870_s29, %s922_s3 }
 0x141   : > { %p606_p3 = scmp.lt.u32.totalorder %s604_s27, %s600_s21  ;;  %p608_p13 = scmp.lt.u32.totalorder %s600_s21, %s870_s29 }
 0x142   : > { %p602_p1 = pnand %p601_p9, %p798_p10 }
 0x143   : > { %p607_p4 = por %p606_p3, %p605_p7 }
 0x144   : > { %p603_p2 = pneg %p602_p1 }
 0x145   : > { %p609_p6 = por %p608_p13, %p607_p4 }
 0x147   : > { %p610_p8 = pnand %p609_p6, %p603_p2 }
 0x149   : > { %613 = shalt.err (!%p610_p8)
}
 0x14a   : > { %456 = dma.vmem_to_hbm [thread:$0]  (%p798_p10), %s872_s10, 128, %s870_s29, %s307_s6  }
 0x14b PF: > { %s333_s22 = sand.u32 1, %s652_s12   ;;  %p940_p12 = scmp.ne.s32.totalorder %s930_s23, 0 }
 0x14c   : > { %p941_p11 = scmp.ge.s32.totalorder %s672_s17, 2  ;;  %s334_s24 = scalar_lea.sflag [#allocation4], %s333_s22 }
 0x14e   : > { %p467_p0 = pnand %p941_p11, %p940_p12 }
 0x150   : > { %647 = dma.done.wait (!%p467_p0), %s334_s24, 128  }
 0x151   : > { %649 = vsyncadd (!%p467_p0), %s334_s24, 4294967168  ;;  %s20_s17 = sadd.s32 1, %s672_s17   ;;  %s942_s12 = smov %s656_s13 }
 0x152   : > { %p17_p5 = scmp.ge.s32.totalorder %s20_s17, 4   ;;  %s943_s13 = smov %s660_s14 }
 0x153   : > { %s944_s14 = smov %s807_s5  ;;  %s945_s15 = smov %s668_s16 }
 0x154   : > { %s946_s16 = smov %s948_s28  ;;  %19 = sbr.rel (!%p17_p5) target bundleno = 7 (0x7), region = 81 }
 0x15b   :  { %339 = vsyncpa [#allocation3], 1 }
 0x15c   :  { %341 = vsyncpa [#allocation3 + $0x1], 1 }
 0x15d   :  { %342 = vsyncpa [#allocation6], 1 }
 0x15e   :  { %343 = vsyncpa [#allocation4], 1 }
 0x15f   :  { %345 = vsyncpa [#allocation4 + $0x1], 1 }

// kernel: tpu_custom_call.1
= control target key start
LH: loop header
LB: loop body
LE: loop exit
PB: predicated region body
PF: predicated region fallthrough
CT: control target
= control target key end

     0   :  { %8 = vsyncpa [#allocation3], 0  ;;  %s919_s0 = inlined_call_operand.hbm [shape: f32[2,8,32], index: 0, kind: input, shape index: {}]   ;;  %s920_s1 = inlined_call_operand.hbm [shape: f32[32,32], index: 1, kind: input, shape index: {}]   ;;  %s921_s2 = inlined_call_operand.vmem [shape: f32[1,32], index: 2, kind: input, shape index: {}]   ;;  %s922_s3 = inlined_call_operand.hbm [shape: f32[2,8,32], index: 3, kind: output, shape index: {}]  }
   0x1   :  { %10 = vsyncpa [#allocation3 + $0x1], 0 }
   0x2   :  { %11 = vsyncpa [#allocation6], 0 }
   0x3   :  { %12 = vsyncpa [#allocation4], 0 }
   0x4   :  { %14 = vsyncpa [#allocation4 + $0x1], 0  ;;  %s702_s12 = smov 0   ;;  %s704_s13 = smov 0  }
   0x5   :  { %s706_s14 = smov 0   ;;  %s708_s15 = smov 0  }
   0x6   :  { %s710_s16 = smov 0   ;;  %s712_s17 = smov 0  }
   0x7 LB: > { %s411_s18 = sadd.s32 4294967295, %s672_s17   ;;  %s412_s19 = sadd.s32 4294967294, %s672_s17   ;;  %s672_s17 = sphi %s712_s17, %s20_s17   ;;  %s668_s16 = sphi %s710_s16, %s946_s16   ;;  %s664_s15 = sphi %s708_s15, %s945_s15   ;;  %s660_s14 = sphi %s706_s14, %s944_s14   ;;  %s656_s13 = sphi %s704_s13, %s943_s13   ;;  %s652_s12 = sphi %s702_s12, %s942_s12  }
   0x8   : > { %p54_p0 = scmp.ne.s32.totalorder %s656_s13, %s652_s12  ;;  %p736_p1 = scmp.eq.s32.totalorder %s411_s18, 0 }
   0x9   : > { %p740_p2 = scmp.eq.s32.totalorder %s411_s18, 1  ;;  %p128_p3 = scmp.eq.s32.totalorder %s412_s19, 1 }
   0xa   : > { %s927_s20 = scalar_select %p736_p1, 1, 0 }
   0xb   : > { %s928_s21 = scalar_select %p740_p2, 1, 0 }
   0xc   : > { %p746_p4 = por %p736_p1, %p54_p0  ;;  %p413_p5 = scmp.ge.s32.totalorder %s672_s17, 1 }
   0xd   : > { %p751_p6 = por %p128_p3, %p54_p0  ;;  %p135_p7 = scmp.lt.s32.totalorder %s672_s17, 3 }
   0xe   : > { %s929_s22 = scalar_select %p746_p4, 1, 0 }
   0xf   : > { %s930_s23 = scalar_select %p751_p6, 1, 0 }
  0x10   : > { %p756_p8 = pnand %p413_p5, %p135_p7  ;;  %s674_s25 = smov [#allocation5]  }
  0x11   : > { %s147_s26 = sshll.u32 %s674_s25, 4  ;;  %s32_s28 = sadd.s32 1, %s668_s16  ;;  %s148_s26 = int_to_ptr.vmem [resolvable:$true] %s147_s26 }
  0x12   : > { %s931_s24 = scalar_select %p756_p8, 1, 0 }
  0x13   : > { %p458_p9 = pneg %p756_p8  ;;  %s528_s4 = scalar_lea.hbm %s920_s1, 512 }
  0x14   : > { %p529_p12 = scmp.ne.s32.totalorder %s920_s1, %s528_s4  ;;  %p535_p5 = scmp.lt.u32.totalorder %s528_s4, %s920_s1 }
  0x15   : > { %p765_p11 = pnand %p458_p9, %p736_p1 }
  0x17   : > { %p530_p13 = pneg %p765_p11 }
  0x19   : > { %p531_p0 = pnand %p530_p13, %p529_p12 }
  0x1b   : > { %p532_p3 = pneg %p531_p0 }
  0x1d   : > { %p537_p7 = pnand %p535_p5, %p532_p3 }
  0x1f   : > { %540 = shalt.err (!%p537_p7)
}
  0x20   : > { %s541_s9 = scalar_lea.vmem %s148_s26, 512  ;;  %p549_p1 = scmp.lt.s32.totalorder %s148_s26, %s148_s26 }
  0x21   : > { %p542_p9 = scmp.ne.s32.totalorder %s148_s26, %s541_s9  ;;  %p550_p4 = scmp.lt.s32.totalorder %s541_s9, %s541_s9 }
  0x23   : > { %p544_p10 = pnand %p542_p9, %p530_p13  ;;  %p551_p8 = por %p550_p4, %p549_p1 }
  0x25   : > { %p545_p6 = pneg %p544_p10 }
  0x27   : > { %p552_p2 = pnand %p551_p8, %p545_p6 }
  0x29   : > { %555 = shalt.err (!%p552_p2)
}
  0x2a   : > { %s675_s10 = smov 128   ;;  %s676_s11 = smov 8  }
  0x2b   : > { %461 = dma.hbm_to_vmem [thread:$0]  (!%p765_p11), %s920_s1, 512, %s148_s26, [#allocation6], %s675_s10, %s675_s10, %s676_s11  }
  0x2c   : > { %p34_p1 = scmp.ge.s32.totalorder %s32_s28, 2  ;;  %s41_s25 = sadd.s32 1, %s660_s14 }
  0x2d   : > { %p48_p2 = scmp.ne.s32.totalorder %s660_s14, %s656_s13  ;;  %p49_p4 = scmp.eq.s32.totalorder %s672_s17, 0 }
  0x2e   : > { %s948_s28 = smov (%p34_p1, %s32_s28), 0  ;;  %p934_p8 = scmp.ne.s32.totalorder %s928_s21, 0 }
  0x2f   : > { %p792_p6 = por %p49_p4, %p48_p2  ;;  %s36_s27 = ssub.s32 %s668_s16, %s948_s28 }
  0x30   : > { %p798_p10 = por %p934_p8, %p48_p2  ;;  %p471_p12 = scmp.lt.s32.totalorder %s672_s17, 2 }
  0x31   : > { %p39_p11 = scmp.eq.s32.totalorder %s36_s27, 0  ;;  %s164_s26 = sand.u32 1, %s660_s14  }
  0x32   : > { %s416_s4 = sshll.u32 %s164_s26, 3  ;;  %s417_s6 = sshll.u32 %s668_s16, 7 }
  0x33   : > { %s807_s5 = scalar_select %p39_p11, %s660_s14, %s41_s25  }
  0x34   : > { %s813_s9 = scalar_lea.hbm %s919_s0, %s417_s6  ;;  %s168_s21 = scalar_lea.vmem [#allocation2], %s416_s4 }
  0x35   : > { %s176_s10 = sshll.u32 %s168_s21, 4  ;;  %p819_p13 = pnand %p471_p12, %p792_p6  ;;  %s815_s10 = int_to_ptr.vmem [resolvable:$true] %s176_s10 }
  0x36   : > { %s165_s18 = scalar_lea.sflag [#allocation3], %s164_s26  ;;  %s556_s19 = scalar_lea.hbm %s813_s9, 128 }
  0x37   : > { %p557_p0 = scmp.ne.s32.totalorder %s813_s9, %s556_s19  ;;  %p558_p3 = pneg %p819_p13 }
  0x38   : > { %s561_s4 = scalar_lea.hbm %s919_s0, 256  ;;  %p562_p9 = scmp.lt.u32.totalorder %s813_s9, %s919_s0 }
  0x39   : > { %p559_p5 = pnand %p558_p3, %p557_p0  ;;  %p563_p1 = scmp.lt.u32.totalorder %s561_s4, %s556_s19 }
  0x3a   : > { %p565_p4 = scmp.lt.u32.totalorder %s556_s19, %s813_s9 }
  0x3b   : > { %p560_p7 = pneg %p559_p5  ;;  %p564_p2 = por %p563_p1, %p562_p9 }
  0x3d   : > { %p566_p6 = por %p565_p4, %p564_p2 }
  0x3f   : > { %p567_p8 = pnand %p566_p6, %p560_p7 }
  0x41   : > { %570 = shalt.err (!%p567_p8)
}
  0x42   : > { %s571_s26 = scalar_lea.vmem %s815_s10, 128  ;;  %s677_s7 = smov [#allocation2]  }
  0x43   : > { %p572_p12 = scmp.ne.s32.totalorder %s815_s10, %s571_s26  ;;  %s576_s8 = sshll.u32 %s677_s7, 4  ;;  %s577_s8 = int_to_ptr.vmem [resolvable:$false] %s576_s8 }
  0x44   : > { %s578_s21 = scalar_lea.vmem %s577_s8, 256  ;;  %p579_p5 = scmp.lt.s32.totalorder %s815_s10, %s577_s8 }
  0x45   : > { %p574_p11 = pnand %p572_p12, %p558_p3  ;;  %p580_p9 = scmp.lt.s32.totalorder %s578_s21, %s571_s26 }
  0x47   : > { %p575_p0 = pneg %p574_p11  ;;  %p581_p1 = por %p580_p9, %p579_p5 }
  0x49   : > { %p582_p2 = pnand %p581_p1, %p575_p0 }
  0x4b   : > { %585 = shalt.err (!%p582_p2)
}
  0x4c   : > { %465 = dma.hbm_to_vmem [thread:$0]  (!%p819_p13), %s813_s9, 128, %s815_s10, %s165_s18  }
  0x4d   : > { %p937_p7 = scmp.ne.s32.totalorder %s931_s24, 0 }
  0x4e   : > { %s851_s19 = sand.u32 (!%p937_p7), 1, %s656_s13   ;;  %p938_p3 = scmp.ne.s32.totalorder (!%p937_p7), %s929_s22, 0 }
  0x4f   : > { %185 = sbr.rel (%p937_p7) target bundleno = 331 (0x14b), region = 32  ;;  %s419_s25 = sshll.u32 (!%p937_p7), %s851_s19, 3 }
  0x50   : > { %s188_s27 = scalar_lea.sflag (!%p937_p7), [#allocation3], %s851_s19  ;;  %s191_s4 = scalar_lea.vmem (!%p937_p7), [#allocation2], %s419_s25 }
  0x56   : > { %639 = dma.done.wait (%p938_p3), %s188_s27, 128  }
  0x57   : > { %641 = vsyncadd (%p938_p3), %s188_s27, 4294967168  ;;  %p939_p4 = scmp.ne.s32.totalorder %s927_s20, 0 }
  0x59   : > { %643 = dma.done.wait (%p939_p4), [#allocation6], 512  }
  0x5a   : > { %645 = vsyncadd (%p939_p4), [#allocation6], 4294966784  ;;  %v678_v0 = vmov 0.0|0.0   ;;  %vm679_vm0 = vmmov 0   ;;  %v680_v1 = vmov 0.0   ;;  %v219_v2 = vld [vmem:[#allocation5] sm:$0xff] }
  0x5b   : > { %444 = vmatprep.subr.bf16.mxu0 %v678_v0  ;;  %441 = vmatprep.mubr.msk.f32.mxu0 %vm679_vm0, %v680_v1  ;;  %v220_v3 = vld [vmem:[#allocation5 + $0x8] sm:$0xff]  ;;  %v221_v4 = vld [vmem:[#allocation5 + $0x10] sm:$0xff]  ;;  %v222_v6 = vld [vmem:[#allocation5 + $0x18] sm:$0xff]  ;;  %vm230_vm1 = vcmask 261120   ;;  %s425_s24 = sshll.u32 %s664_s15, 7  ;;  %s217_s9 = scalar_lea.vmem [#allocation7], %s419_s25 }
  0x5c   : > { %v445_v5 = vpack.c.bf16 %v220_v3, %v219_v2  ;;  %v448_v7 = vpack.c.bf16 %v222_v6, %v221_v4  ;;  %v218_v8 = vld [vmem:[%s191_s4] sm:$0xff]  ;;  %s321_s10 = sshll.u32 %s217_s9, 4  ;;  %s870_s29 = scalar_lea.hbm %s922_s3, %s425_s24  ;;  %s872_s10 = int_to_ptr.vmem [resolvable:$true] %s321_s10 }
  0x5d   : > { %v422_v9 = vld [vmem:[%s921_s2] ss:$0 sm:$0xff]  ;;  %s307_s6 = scalar_lea.sflag [#allocation4], %s851_s19  ;;  %s586_s26 = scalar_lea.vmem %s872_s10, 128 }
  0x5e   : > { %446 = vmatpush3.bf16.msra.mxu0 %v445_v5  ;;  %p587_p13 = scmp.ne.s32.totalorder %s872_s10, %s586_s26  ;;  %s681_s15 = smov [#allocation7]  }
  0x5f   : > { %447 = vmatprep.subr.bf16.mxu0 %v678_v0  ;;  %s590_s7 = sshll.u32 %s681_s15, 4  ;;  %s591_s7 = int_to_ptr.vmem [resolvable:$false] %s590_s7 }
  0x60   : > { %p588_p6 = pnand %p587_p13, %p798_p10  ;;  %s592_s8 = scalar_lea.vmem %s591_s7, 256 }
  0x61   : > { %p593_p12 = scmp.lt.s32.totalorder %s872_s10, %s591_s7  ;;  %p594_p11 = scmp.lt.s32.totalorder %s592_s8, %s586_s26 }
  0x62   : > { %449 = vmatpush3.bf16.msra.mxu0 %v448_v7  ;;  %p589_p8 = pneg %p588_p6 }
  0x63   : > { %p595_p0 = por %p594_p11, %p593_p12 }
  0x65   : > { %442 = vmatmul.mubr.msk.f32.vlgmr.msra.gmra.mrb[0].mxu0 %vm230_vm1, %v218_v8  ;;  %p596_p5 = pnand %p595_p0, %p589_p8 }
 0x138   : > { %v300_v10 = vpop.f32.mrb[0].mxu0 }
 0x139   : > { %v301_v11 = vadd.f32 %v422_v9, %v300_v10  ;;  %v443_v12 = vpop.f32.mrb[1].mxu0 }
 0x13b   : > { %v304_v13 = vmul.f32 0.35355338, %v301_v11 }
 0x13d   : > { %305 = vst.msk [vmem:[%s217_s9] sm:$0xff] %vm230_vm1, %v304_v13 }
 0x13e   : > { %599 = shalt.err (!%p596_p5)
}
 0x13f   : > { %s600_s21 = scalar_lea.hbm %s870_s29, 128  ;;  %s604_s27 = scalar_lea.hbm %s922_s3, 256 }
 0x140   : > { %p601_p9 = scmp.ne.s32.totalorder %s870_s29, %s600_s21  ;;  %p605_p7 = scmp.lt.u32.totalorder %s870_s29, %s922_s3 }
 0x141   : > { %p606_p3 = scmp.lt.u32.totalorder %s604_s27, %s600_s21  ;;  %p608_p13 = scmp.lt.u32.totalorder %s600_s21, %s870_s29 }
 0x142   : > { %p602_p1 = pnand %p601_p9, %p798_p10 }
 0x143   : > { %p607_p4 = por %p606_p3, %p605_p7 }
 0x144   : > { %p603_p2 = pneg %p602_p1 }
 0x145   : > { %p609_p6 = por %p608_p13, %p607_p4 }
 0x147   : > { %p610_p8 = pnand %p609_p6, %p603_p2 }
 0x149   : > { %613 = shalt.err (!%p610_p8)
}
 0x14a   : > { %456 = dma.vmem_to_hbm [thread:$0]  (%p798_p10), %s872_s10, 128, %s870_s29, %s307_s6  }
 0x14b PF: > { %s333_s22 = sand.u32 1, %s652_s12   ;;  %p940_p12 = scmp.ne.s32.totalorder %s930_s23, 0 }
 0x14c   : > { %p941_p11 = scmp.ge.s32.totalorder %s672_s17, 2  ;;  %s334_s24 = scalar_lea.sflag [#allocation4], %s333_s22 }
 0x14e   : > { %p467_p0 = pnand %p941_p11, %p940_p12 }
 0x150   : > { %647 = dma.done.wait (!%p467_p0), %s334_s24, 128  }
 0x151   : > { %649 = vsyncadd (!%p467_p0), %s334_s24, 4294967168  ;;  %s20_s17 = sadd.s32 1, %s672_s17   ;;  %s942_s12 = smov %s656_s13 }
 0x152   : > { %p17_p5 = scmp.ge.s32.totalorder %s20_s17, 4   ;;  %s943_s13 = smov %s660_s14 }
 0x153   : > { %s944_s14 = smov %s807_s5  ;;  %s945_s15 = smov %s668_s16 }
 0x154   : > { %s946_s16 = smov %s948_s28  ;;  %19 = sbr.rel (!%p17_p5) target bundleno = 7 (0x7), region = 81 }
 0x15b   :  { %339 = vsyncpa [#allocation3], 1 }
 0x15c   :  { %341 = vsyncpa [#allocation3 + $0x1], 1 }
 0x15d   :  { %342 = vsyncpa [#allocation6], 1 }
 0x15e   :  { %343 = vsyncpa [#allocation4], 1 }
 0x15f   :  { %345 = vsyncpa [#allocation4 + $0x1], 1 }

</bundles_post_ra>
